<compile_context>
chip_gen: v7x
topology: tpu7x:2x2x1
jax: 0.10.0
libtpu: 0.0.40
codegen_flags: <defaults>
</compile_context>

<pallas_src>
import jax
import jax.numpy as jnp
from jax.experimental import pallas as pl
from jax.experimental.pallas import tpu as pltpu

LANES = 128
_TM_MAX = 1024  # rows per tile (multiple of 8); 3 x 2 x (1024*128*4B) = 3 MiB VMEM


def _make_partial_kernel(tm: int, rows: int, needs_mask: bool):
    """Per-block fused multiply + (tm,128) -> (8,128) partial-sum kernel."""
    sub = tm // 8  # tm is always a multiple of 8

    def kernel(pred_ref, tgt_ref, intf_ref, out_int_ref, out_tgt_ref):
        p = pred_ref[...].astype(jnp.float32)
        prod_int = p * intf_ref[...].astype(jnp.float32)
        prod_tgt = p * tgt_ref[...].astype(jnp.float32)

        if needs_mask:
            # Only the ragged last grid block contains out-of-bounds rows;
            # mask them (select-to-zero, NaN-safe) instead of padding in HBM.
            i = pl.program_id(0)
            row = i * tm + jax.lax.broadcasted_iota(jnp.int32, (tm, LANES), 0)
            valid = row < rows
            prod_int = jnp.where(valid, prod_int, 0.0)
            prod_tgt = jnp.where(valid, prod_tgt, 0.0)

        # (tm, 128) -> (8, 128): pure vreg adds on the VPU; the single
        # cross-lane/sublane reduction happens once, outside the kernel.
        out_int_ref[...] = jnp.sum(prod_int.reshape(sub, 8, LANES), axis=0).reshape(1, 8, LANES)
        out_tgt_ref[...] = jnp.sum(prod_tgt.reshape(sub, 8, LANES), axis=0).reshape(1, 8, LANES)

    return kernel


def signal_interference_ratio(prediction, target, interference, epsilon=2e-07):
    assert prediction.shape == target.shape == interference.shape
    n_elem = int(prediction.size)
    chunk = 8 * LANES  # 1024 elements = one (8, 128) vreg worth

    # Row-major flatten is free for contiguous inputs; keep native dtype.
    flats = [jnp.ravel(x) for x in (prediction, target, interference)]
    if n_elem % chunk != 0:
        # Rare fallback (unaligned total size): zero-pad up to a multiple of
        # 8*128.  Pad elements contribute 0 to both sums; the mean divides by
        # the true n_elem.
        total = pl.cdiv(n_elem, chunk) * chunk
        flats = [jnp.pad(f, (0, total - n_elem)) for f in flats]
    else:
        total = n_elem

    rows = total // LANES          # multiple of 8
    tm = min(_TM_MAX, rows)        # multiple of 8
    nb = pl.cdiv(rows, tm)
    needs_mask = (nb * tm) != rows  # ragged last grid block only

    mats = [f.reshape(rows, LANES) for f in flats]  # free reshape

    in_spec = pl.BlockSpec((tm, LANES), lambda i: (i, 0))
    out_spec = pl.BlockSpec((1, 8, LANES), lambda i: (i, 0, 0))

    part_int, part_tgt = pl.pallas_call(
        _make_partial_kernel(tm, rows, needs_mask),
        out_shape=(
            jax.ShapeDtypeStruct((nb, 8, LANES), jnp.float32),
            jax.ShapeDtypeStruct((nb, 8, LANES), jnp.float32),
        ),
        grid=(nb,),
        in_specs=[in_spec, in_spec, in_spec],
        out_specs=(out_spec, out_spec),
        compiler_params=pltpu.CompilerParams(
            dimension_semantics=("parallel",),  # lets v7x split blocks over both TCs
        ),
    )(*mats)

    # Tiny final combine (cross-block + cross-lane reduce, ratio, epsilon).
    inv_n = jnp.float32(1.0 / n_elem)
    mean_int = jnp.sum(part_int) * inv_n   # mean(prediction * interference)
    mean_tgt = jnp.sum(part_tgt) * inv_n   # mean(prediction * target)
    return (mean_int * mean_int) / (mean_tgt * mean_tgt + jnp.float32(epsilon))


def _reference(prediction, target, interference, epsilon=2e-07):
    mi = jnp.mean(prediction * interference)
    mt = jnp.mean(prediction * target)
    return (mi ** 2) / (mt ** 2 + epsilon)


if __name__ == "__main__":
    key = jax.random.PRNGKey(0)
    k1, k2, k3 = jax.random.split(key, 3)
    shape = (2, 4, 16, 16)  # NCHW, same convention as the PyTorch module
    prediction = jax.random.normal(k1, shape, dtype=jnp.float32)
    target = jax.random.normal(k2, shape, dtype=jnp.float32)
    interference = jax.random.normal(k3, shape, dtype=jnp.float32)

    sir = signal_interference_ratio(prediction, target, interference)
    sir = jax.block_until_ready(sir)

    ref = _reference(prediction, target, interference)
    assert jnp.allclose(sir, ref, rtol=1e-5, atol=1e-6), (sir, ref)
    print("KERNEL_OK")
</pallas_src>

<mosaic_0001>
module attributes {stable_mosaic.version = 11 : i64} {
  func.func @kernel(%arg0: i32, %arg1: memref<16x128xf32, #tpu.memory_space<vmem>>, %arg2: memref<16x128xf32, #tpu.memory_space<vmem>>, %arg3: memref<16x128xf32, #tpu.memory_space<vmem>>, %arg4: memref<1x8x128xf32, #tpu.memory_space<vmem>>, %arg5: memref<1x8x128xf32, #tpu.memory_space<vmem>>) attributes {dimension_semantics = [#tpu.dimension_semantics<parallel>], iteration_bounds = array<i64: 1>, scalar_prefetch = 0 : i64, scratch_operands = 0 : i64, tpu.core_type = #tpu.core_type<tc>, window_params = [{transform_indices = @transform_0, window_bounds = array<i64: 16, 128>}, {transform_indices = @transform_1, window_bounds = array<i64: 16, 128>}, {transform_indices = @transform_2, window_bounds = array<i64: 16, 128>}, {transform_indices = @transform_3, window_bounds = array<i64: 1, 8, 128>}, {transform_indices = @transform_4, window_bounds = array<i64: 1, 8, 128>}]} {
    %c0 = arith.constant 0 : index
    %c0_0 = arith.constant 0 : index
    %0 = vector.load %arg1[%c0, %c0_0] : memref<16x128xf32, #tpu.memory_space<vmem>>, vector<16x128xf32>
    %c0_1 = arith.constant 0 : index
    %c0_2 = arith.constant 0 : index
    %1 = vector.load %arg3[%c0_1, %c0_2] : memref<16x128xf32, #tpu.memory_space<vmem>>, vector<16x128xf32>
    %2 = arith.mulf %0, %1 : vector<16x128xf32>
    %c0_3 = arith.constant 0 : index
    %c0_4 = arith.constant 0 : index
    %3 = vector.load %arg2[%c0_3, %c0_4] : memref<16x128xf32, #tpu.memory_space<vmem>>, vector<16x128xf32>
    %4 = arith.mulf %0, %3 : vector<16x128xf32>
    %5 = vector.shape_cast %2 : vector<16x128xf32> to vector<2x8x128xf32>
    %cst = arith.constant dense<0.000000e+00> : vector<8x128xf32>
    %6 = vector.multi_reduction <add>, %5, %cst [0] : vector<2x8x128xf32> to vector<8x128xf32>
    %7 = vector.shape_cast %6 : vector<8x128xf32> to vector<1x8x128xf32>
    %c0_5 = arith.constant 0 : index
    %c0_6 = arith.constant 0 : index
    %c0_7 = arith.constant 0 : index
    %8 = vector.load %arg4[%c0_5, %c0_6, %c0_7] : memref<1x8x128xf32, #tpu.memory_space<vmem>>, vector<1x8x128xf32>
    tpu.vector_store %arg4[%c0_5, %c0_6, %c0_7], %7 {strides = array<i32>} : memref<1x8x128xf32, #tpu.memory_space<vmem>>, vector<1x8x128xf32>,
    %9 = vector.shape_cast %4 : vector<16x128xf32> to vector<2x8x128xf32>
    %cst_8 = arith.constant dense<0.000000e+00> : vector<8x128xf32>
    %10 = vector.multi_reduction <add>, %9, %cst_8 [0] : vector<2x8x128xf32> to vector<8x128xf32>
    %11 = vector.shape_cast %10 : vector<8x128xf32> to vector<1x8x128xf32>
    %c0_9 = arith.constant 0 : index
    %c0_10 = arith.constant 0 : index
    %c0_11 = arith.constant 0 : index
    %12 = vector.load %arg5[%c0_9, %c0_10, %c0_11] : memref<1x8x128xf32, #tpu.memory_space<vmem>>, vector<1x8x128xf32>
    tpu.vector_store %arg5[%c0_9, %c0_10, %c0_11], %11 {strides = array<i32>} : memref<1x8x128xf32, #tpu.memory_space<vmem>>, vector<1x8x128xf32>,
    return
  }
  func.func @transform_0(%arg0: i32) -> (i32, i32) {
    %c0_i32 = arith.constant 0 : i32
    %c0_i32_0 = arith.constant 0 : i32
    return %arg0, %c0_i32 : i32, i32
  }
  func.func @transform_1(%arg0: i32) -> (i32, i32) {
    %c0_i32 = arith.constant 0 : i32
    %c0_i32_0 = arith.constant 0 : i32
    return %arg0, %c0_i32 : i32, i32
  }
  func.func @transform_2(%arg0: i32) -> (i32, i32) {
    %c0_i32 = arith.constant 0 : i32
    %c0_i32_0 = arith.constant 0 : i32
    return %arg0, %c0_i32 : i32, i32
  }
  func.func @transform_3(%arg0: i32) -> (i32, i32, i32) {
    %c0_i32 = arith.constant 0 : i32
    %c0_i32_0 = arith.constant 0 : i32
    %c0_i32_1 = arith.constant 0 : i32
    return %arg0, %c0_i32, %c0_i32_0 : i32, i32, i32
  }
  func.func @transform_4(%arg0: i32) -> (i32, i32, i32) {
    %c0_i32 = arith.constant 0 : i32
    %c0_i32_0 = arith.constant 0 : i32
    %c0_i32_1 = arith.constant 0 : i32
    return %arg0, %c0_i32, %c0_i32_0 : i32, i32, i32
  }
}

</mosaic_0001>

<bundles_post_ra>
// kernel: tpu_custom_call.1
= control target key start
LH: loop header
LB: loop body
LE: loop exit
PB: predicated region body
PF: predicated region fallthrough
CT: control target
= control target key end

     0   :  { %10 = vsyncpa [#allocation3], 0  ;;  %s336_s0 = inlined_call_operand.hbm [shape: f32[16,128], index: 0, kind: input, shape index: {}]   ;;  %s337_s1 = inlined_call_operand.hbm [shape: f32[16,128], index: 1, kind: input, shape index: {}]   ;;  %s338_s2 = inlined_call_operand.hbm [shape: f32[16,128], index: 2, kind: input, shape index: {}]   ;;  %s339_s3 = inlined_call_operand.hbm [shape: f32[1,8,128], index: 3, kind: output, shape index: {0}]   ;;  %s340_s4 = inlined_call_operand.hbm [shape: f32[1,8,128], index: 4, kind: output, shape index: {1}]  }
   0x1   :  { %11 = vsyncpa [#allocation6], 0 }
   0x2   :  { %12 = vsyncpa [#allocation4], 0 }
   0x3   :  { %13 = vsyncpa [#allocation10], 0  ;;  %s228_s15 = smov [#allocation5]   ;;  %s229_s17 = smov [#allocation2]  }
   0x4   :  { %s31_s16 = sshll.u32 %s228_s15, 4  ;;  %s19_s18 = sshll.u32 %s229_s17, 4  ;;  %s32_s16 = int_to_ptr.vmem [resolvable:$true] %s31_s16  ;;  %s260_s18 = int_to_ptr.vmem [resolvable:$true] %s19_s18 }
   0x5   :  { %s110_s21 = scalar_lea.hbm %s337_s1, 256 }
   0x6   :  { %p111_p0 = scmp.ne.s32.totalorder %s337_s1, %s110_s21  ;;  %p114_p1 = scmp.lt.u32.totalorder %s110_s21, %s337_s1 }
   0x8   :  { %p116_p2 = pnand %p114_p1, %p111_p0 }
   0xa   :  { %119 = shalt.err (!%p116_p2)
}
   0xb   :  { %s120_s26 = scalar_lea.vmem %s32_s16, 256  ;;  %p125_p4 = scmp.lt.s32.totalorder %s32_s16, %s32_s16 }
   0xc   :  { %p121_p3 = scmp.ne.s32.totalorder %s32_s16, %s120_s26  ;;  %p126_p5 = scmp.lt.s32.totalorder %s120_s26, %s120_s26 }
   0xe   :  { %p127_p6 = por %p126_p5, %p125_p4 }
  0x10   :  { %p128_p7 = pnand %p127_p6, %p121_p3 }
  0x12   :  { %131 = shalt.err (!%p128_p7)
}
  0x13   :  { %s230_s27 = smov 128   ;;  %s231_s28 = smov 8  }
  0x14   :  { %37 = dma.hbm_to_vmem [thread:$0]  %s337_s1, 256, %s32_s16, [#allocation6], %s230_s27, %s230_s27, %s231_s28  }
  0x15   :  { %s132_s7 = scalar_lea.hbm %s336_s0, 256 }
  0x16   :  { %p133_p8 = scmp.ne.s32.totalorder %s336_s0, %s132_s7  ;;  %p136_p9 = scmp.lt.u32.totalorder %s132_s7, %s336_s0 }
  0x18   :  { %p138_p10 = pnand %p136_p9, %p133_p8 }
  0x1a   :  { %141 = shalt.err (!%p138_p10)
}
  0x1b   :  { %s142_s12 = scalar_lea.vmem %s260_s18, 256  ;;  %p147_p12 = scmp.lt.s32.totalorder %s260_s18, %s260_s18 }
  0x1c   :  { %p143_p11 = scmp.ne.s32.totalorder %s260_s18, %s142_s12  ;;  %p148_p13 = scmp.lt.s32.totalorder %s142_s12, %s142_s12 }
  0x1e   :  { %p149_p0 = por %p148_p13, %p147_p12 }
  0x20   :  { %p150_p1 = pnand %p149_p0, %p143_p11 }
  0x22   :  { %153 = shalt.err (!%p150_p1)
}
  0x23   :  { %25 = dma.hbm_to_vmem [thread:$0]  %s336_s0, 256, %s260_s18, [#allocation3], %s230_s27, %s230_s27, %s231_s28  }
  0x24   :  { %s232_s14 = smov [#allocation7]   ;;  %s154_s19 = scalar_lea.hbm %s338_s2, 256 }
  0x25   :  { %s43_s15 = sshll.u32 %s232_s14, 4  ;;  %p155_p2 = scmp.ne.s32.totalorder %s338_s2, %s154_s19  ;;  %s44_s15 = int_to_ptr.vmem [resolvable:$true] %s43_s15 }
  0x26   :  { %p158_p3 = scmp.lt.u32.totalorder %s154_s19, %s338_s2 }
  0x28   :  { %p160_p4 = pnand %p158_p3, %p155_p2 }
  0x2a   :  { %163 = shalt.err (!%p160_p4)
}
  0x2b   :  { %s164_s24 = scalar_lea.vmem %s44_s15, 256  ;;  %p169_p6 = scmp.lt.s32.totalorder %s44_s15, %s44_s15 }
  0x2c   :  { %p165_p5 = scmp.ne.s32.totalorder %s44_s15, %s164_s24  ;;  %p170_p7 = scmp.lt.s32.totalorder %s164_s24, %s164_s24 }
  0x2e   :  { %p171_p8 = por %p170_p7, %p169_p6 }
  0x30   :  { %p172_p9 = pnand %p171_p8, %p165_p5 }
  0x32   :  { %175 = shalt.err (!%p172_p9)
}
  0x33   :  { %49 = dma.hbm_to_vmem [thread:$0]  %s338_s2, 256, %s44_s15, [#allocation6], %s230_s27, %s230_s27, %s231_s28  }
  0x34   :  { %220 = dma.done.wait [#allocation3], 256  }
  0x35   :  { %221 = vsyncadd [#allocation3], 4294967040 }
  0x36   :  { %222 = dma.done.wait [#allocation6], 512  }
  0x37   :  { %223 = vsyncadd [#allocation6], 4294966784  ;;  %v59_v0 = vld [vmem:[#allocation2] sm:$0xff]  ;;  %v60_v1 = vld [vmem:[#allocation2 + $0x8] sm:$0xff]  ;;  %s233_s25 = smov [#allocation8]   ;;  %s234_s29 = smov [#allocation9]  }
  0x38   :  { %v61_v2 = vld [vmem:[#allocation7] sm:$0xff]  ;;  %v62_v3 = vld [vmem:[#allocation7 + $0x8] sm:$0xff]  ;;  %v65_v5 = vld [vmem:[#allocation5] sm:$0xff]  ;;  %s79_s26 = sshll.u32 %s233_s25, 4  ;;  %s89_s30 = sshll.u32 %s234_s29, 4  ;;  %s80_s26 = int_to_ptr.vmem [resolvable:$true] %s79_s26  ;;  %s90_s30 = int_to_ptr.vmem [resolvable:$true] %s89_s30 }
  0x39   :  { %v63_v4 = vmul.f32 %v61_v2, %v59_v0  ;;  %v66_v6 = vld [vmem:[#allocation5 + $0x8] sm:$0xff]  ;;  %v64_v7 = vmul.f32 %v62_v3, %v60_v1  ;;  %v67_v8 = vmul.f32 %v65_v5, %v59_v0  ;;  %s176_s2 = scalar_lea.vmem %s80_s26, 128  ;;  %p181_p11 = scmp.lt.s32.totalorder %s80_s26, %s80_s26 }
  0x3a   :  { %v68_v9 = vmul.f32 %v66_v6, %v60_v1  ;;  %p177_p10 = scmp.ne.s32.totalorder %s80_s26, %s176_s2  ;;  %p182_p12 = scmp.lt.s32.totalorder %s176_s2, %s176_s2 }
  0x3b   :  { %v69_v10 = vadd.f32 %v64_v7, %v63_v4 }
  0x3c   :  { %v71_v11 = vadd.f32 %v68_v9, %v67_v8  ;;  %p183_p13 = por %p182_p12, %p181_p11 }
  0x3d   :  { %70 = vst [vmem:[#allocation8] sm:$0xff] %v69_v10 }
  0x3e   :  { %72 = vst [vmem:[#allocation9] sm:$0xff] %v71_v11  ;;  %p184_p0 = pnand %p183_p13, %p177_p10 }
  0x40   :  { %187 = shalt.err (!%p184_p0)
}
  0x41   :  { %s188_s5 = scalar_lea.hbm %s339_s3, 128 }
  0x42   :  { %p189_p1 = scmp.ne.s32.totalorder %s339_s3, %s188_s5  ;;  %p192_p2 = scmp.lt.u32.totalorder %s188_s5, %s339_s3 }
  0x44   :  { %p194_p3 = pnand %p192_p2, %p189_p1 }
  0x46   :  { %197 = shalt.err (!%p194_p3)
}
  0x47   :  { %82 = dma.vmem_to_hbm [thread:$0]  %s80_s26, 128, %s339_s3, [#allocation4]  }
  0x48   :  { %s198_s12 = scalar_lea.vmem %s90_s30, 128  ;;  %p203_p5 = scmp.lt.s32.totalorder %s90_s30, %s90_s30 }
  0x49   :  { %p199_p4 = scmp.ne.s32.totalorder %s90_s30, %s198_s12  ;;  %p204_p6 = scmp.lt.s32.totalorder %s198_s12, %s198_s12 }
  0x4b   :  { %p205_p7 = por %p204_p6, %p203_p5 }
  0x4d   :  { %p206_p8 = pnand %p205_p7, %p199_p4 }
  0x4f   :  { %209 = shalt.err (!%p206_p8)
}
  0x50   :  { %s210_s14 = scalar_lea.hbm %s340_s4, 128 }
  0x51   :  { %p211_p9 = scmp.ne.s32.totalorder %s340_s4, %s210_s14  ;;  %p214_p10 = scmp.lt.u32.totalorder %s210_s14, %s340_s4 }
  0x53   :  { %p216_p11 = pnand %p214_p10, %p211_p9 }
  0x55   :  { %219 = shalt.err (!%p216_p11)
}
  0x56   :  { %92 = dma.vmem_to_hbm [thread:$0]  %s90_s30, 128, %s340_s4, [#allocation10]  }
  0x57   :  { %224 = dma.done.wait [#allocation4], 128  }
  0x58   :  { %225 = vsyncadd [#allocation4], 4294967168 }
  0x59   :  { %226 = dma.done.wait [#allocation10], 128  }
  0x5a   :  { %227 = vsyncadd [#allocation10], 4294967168 }
  0x5b   :  { %99 = vsyncpa [#allocation3], 1 }
  0x5c   :  { %100 = vsyncpa [#allocation6], 1 }
  0x5d   :  { %101 = vsyncpa [#allocation4], 1 }
  0x5e   :  { %102 = vsyncpa [#allocation10], 1 }

</bundles_post_ra>
